<compile_context>
chip_gen: v6e
topology: v6e:2x2x1
jax: 0.10.0
libtpu: 0.0.40
codegen_flags: <defaults>
</compile_context>

<pallas_src>
import jax
import jax.numpy as jnp
from jax.experimental import pallas as pl
from jax.experimental.pallas import tpu as pltpu

LN_EPS = 1e-5


def _round_up(n, m):
    return (n + m - 1) // m * m


def _layernorm_f32(h, gamma, beta):
    # PyTorch LayerNorm semantics: biased variance, eps inside rsqrt. h is f32.
    # One-pass moments: the two reductions are independent (both XLUs can run
    # concurrently) and we skip the extra full-tile (h - mean) pass before the
    # variance reduce. var is clamped at 0 for numerical safety.
    n = h.shape[-1]
    inv_n = 1.0 / n
    mean = jnp.sum(h, axis=-1, keepdims=True) * inv_n
    ex2 = jnp.sum(h * h, axis=-1, keepdims=True) * inv_n
    var = jnp.maximum(ex2 - mean * mean, 0.0)
    inv = jax.lax.rsqrt(var + LN_EPS)
    return (h - mean) * inv * gamma + beta


def residual_block_kernel(x_ref, w1_ref, w2_ref, vec_ref, o_ref):
    # Packed per-feature params: rows 0..5 = b1, g1, be1, b2, g2, be2 (rows 6,7 pad).
    vecs = vec_ref[...].astype(jnp.float32)
    b1, g1, be1 = vecs[0:1, :], vecs[1:2, :], vecs[2:3, :]
    b2, g2, be2 = vecs[3:4, :], vecs[4:5, :], vecs[5:6, :]

    w1 = w1_ref[...]  # (D, D) bf16, stored (in, out): canonical [M,K] x [K,N]
    w2 = w2_ref[...]

    tb = x_ref.shape[0]
    n_chunks = 2 if (tb >= 16 and tb % 16 == 0) else 1
    rows = tb // n_chunks

    # Static unroll over independent row sub-chunks: lets the VLIW scheduler
    # overlap chunk k+1's MXU pushes with chunk k's LayerNorm/ReLU epilogue.
    for c in range(n_chunks):
        sl = slice(c * rows, (c + 1) * rows)
        x = x_ref[sl, :]

        # Linear 1: bf16 MXU operands, f32 accumulation.
        h = jnp.dot(x.astype(w1.dtype), w1,
                    preferred_element_type=jnp.float32) + b1
        # LayerNorm 1 + ReLU (f32 epilogue).
        h = _layernorm_f32(h, g1, be1)
        h = jnp.maximum(h, 0.0)

        # Dropout(0.1): identity in eval mode.

        # Linear 2: bf16 MXU operands, f32 accumulation.
        h = jnp.dot(h.astype(w2.dtype), w2,
                    preferred_element_type=jnp.float32) + b2
        # LayerNorm 2.
        h = _layernorm_f32(h, g2, be2)

        # Residual add in f32, cast to output dtype.
        o_ref[sl, :] = (x.astype(jnp.float32) + h).astype(o_ref.dtype)


def residual_block(x, params, *, block_rows=512, vmem_budget_bytes=48 << 20):
    """x: (B, D). params: (w1, b1, g1, be1, w2, b2, g2, be2) with w* in (out, in)."""
    B, D = x.shape
    w1, b1, g1, be1, w2, b2, g2, be2 = params

    # One-time HBM-side prep: transpose PyTorch (out, in) -> (in, out) and cast
    # to bf16 (native MXU dtype on all three generations; halves resident VMEM
    # and weight HBM traffic).
    w1_t = jnp.asarray(w1.T, dtype=jnp.bfloat16)
    w2_t = jnp.asarray(w2.T, dtype=jnp.bfloat16)

    # Pack the six (D,) per-feature vectors into a single (8, D) f32 slab.
    vecs = jnp.concatenate(
        [jnp.stack([b1, g1, be1, b2, g2, be2]).astype(jnp.float32),
         jnp.zeros((2, D), jnp.float32)],
        axis=0)

    x_bytes = jnp.dtype(x.dtype).itemsize
    w_bytes = 2  # bf16 weights

    # Resident footprint: two single-buffered (D, D) bf16 weights + the vec slab.
    resident_bytes = 2 * D * D * w_bytes + 8 * D * 4
    assert resident_bytes <= vmem_budget_bytes, (
        f"resident weights ({resident_bytes} B) exceed the VMEM budget "
        f"({vmem_budget_bytes} B) — this D needs a streamed-weight variant")
    # TODO(synk): streamed-weight path (grid over D_out with an inner K pipeline)
    # for very large D that does not fit resident even in bf16 on v7x (64 MiB/TC).

    # Batch tile: multiple of 8 sublanes, capped by (a) block_rows, (b) what is
    # left of the VMEM budget after the resident weights (x / out tiles are
    # double-buffered by the pipeline), and (c) a cap keeping the grid at >= 2
    # steps so the batch axis actually splits across TensorCores on v7x.
    B8 = _round_up(B, 8)
    per_row_bytes = 2 * D * x_bytes + 2 * D * x_bytes  # 2x-buffered x tile + out tile
    budget_rows = max(
        8, ((vmem_budget_bytes - resident_bytes) // per_row_bytes) // 8 * 8)
    split_cap = max(8, _round_up(pl.cdiv(B8, 2), 8))
    TB = max(8, (min(block_rows, budget_rows, split_cap, B8) // 8) * 8)

    Bp = _round_up(B, TB)
    x_in = x if Bp == B else jnp.pad(x, ((0, Bp - B), (0, 0)))
    grid = (Bp // TB,)

    vmem_limit = int(min(
        128 << 20,
        max(resident_bytes + TB * per_row_bytes + (4 << 20), 32 << 20)))

    cost = pl.CostEstimate(
        flops=4 * Bp * D * D,                 # two (Bp, D) x (D, D) matmuls
        transcendentals=2 * Bp,               # two rsqrt per row
        bytes_accessed=2 * Bp * D * x_bytes + 2 * D * D * w_bytes + 8 * D * 4)

    out = pl.pallas_call(
        residual_block_kernel,
        out_shape=jax.ShapeDtypeStruct((Bp, D), x.dtype),
        grid=grid,
        in_specs=[
            pl.BlockSpec((TB, D), lambda i: (i, 0)),              # x: streamed tiles
            pl.BlockSpec((D, D), lambda i: (0, 0),
                         pipeline_mode=pl.Buffered(1)),           # w1: resident, 1 buffer
            pl.BlockSpec((D, D), lambda i: (0, 0),
                         pipeline_mode=pl.Buffered(1)),           # w2: resident, 1 buffer
            pl.BlockSpec((8, D), lambda i: (0, 0),
                         pipeline_mode=pl.Buffered(1)),           # packed b/gamma/beta
        ],
        out_specs=pl.BlockSpec((TB, D), lambda i: (i, 0)),
        compiler_params=pltpu.CompilerParams(
            dimension_semantics=("parallel",),
            vmem_limit_bytes=vmem_limit),
        cost_estimate=cost,
    )(x_in, w1_t, w2_t, vecs)

    return out[:B] if Bp != B else out


def init_params(key, dim):
    # Deterministic init mirroring the PyTorch module's parameter shapes:
    #   Linear(dim, dim): weight (dim, dim) [out, in], bias (dim,)
    #   LayerNorm(dim):   gamma ones, beta zeros
    k1, k2, k3, k4 = jax.random.split(key, 4)
    bound = 1.0 / jnp.sqrt(dim)
    w1 = jax.random.uniform(k1, (dim, dim), jnp.float32, -bound, bound)
    b1 = jax.random.uniform(k2, (dim,), jnp.float32, -bound, bound)
    g1 = jnp.ones((dim,), jnp.float32)
    be1 = jnp.zeros((dim,), jnp.float32)
    w2 = jax.random.uniform(k3, (dim, dim), jnp.float32, -bound, bound)
    b2 = jax.random.uniform(k4, (dim,), jnp.float32, -bound, bound)
    g2 = jnp.ones((dim,), jnp.float32)
    be2 = jnp.zeros((dim,), jnp.float32)
    return (w1, b1, g1, be1, w2, b2, g2, be2)


def reference(x, params):
    # Pure-JAX f32 reference (eval-mode PyTorch semantics).
    w1, b1, g1, be1, w2, b2, g2, be2 = params

    def ln(h, g, b):
        m = jnp.mean(h, -1, keepdims=True)
        v = jnp.mean((h - m) ** 2, -1, keepdims=True)
        return (h - m) / jnp.sqrt(v + LN_EPS) * g + b

    h = x @ w1.T + b1
    h = ln(h, g1, be1)
    h = jnp.maximum(h, 0.0)
    h = h @ w2.T + b2
    h = ln(h, g2, be2)
    return x + h


if __name__ == "__main__":
    key = jax.random.PRNGKey(0)
    kx, kp = jax.random.split(key)

    # Small, lane-aligned demo shape (D a multiple of 128 keeps stores lane-dense).
    B, D = 16, 128
    x = jax.random.normal(kx, (B, D), jnp.float32)
    params = init_params(kp, D)

    out = residual_block(x, params)
    out = jax.block_until_ready(out)

    ref = reference(x, params)
    assert out.shape == (B, D)
    # Tolerance loosened vs the f32 reference: the MXU operands are bf16
    # (f32 accumulation + f32 LayerNorm epilogue keep the error small).
    assert jnp.allclose(out, ref, atol=5e-2, rtol=5e-2), "mismatch vs reference"

    print("KERNEL_OK")
</pallas_src>

<mosaic_0001>
module attributes {stable_mosaic.version = 11 : i64} {
  func.func @residual_block_kernel(%arg0: i32, %arg1: memref<8x128xf32, #tpu.memory_space<vmem>>, %arg2: memref<128x128xbf16, #tpu.memory_space<vmem>>, %arg3: memref<128x128xbf16, #tpu.memory_space<vmem>>, %arg4: memref<8x128xf32, #tpu.memory_space<vmem>>, %arg5: memref<8x128xf32, #tpu.memory_space<vmem>>) attributes {dimension_semantics = [#tpu.dimension_semantics<parallel>], iteration_bounds = array<i64: 2>, scalar_prefetch = 0 : i64, scratch_operands = 0 : i64, tpu.core_type = #tpu.core_type<tc>, window_params = [{transform_indices = @transform_0, window_bounds = array<i64: 8, 128>}, {pipeline_mode = #tpu.pipeline_mode<synchronous>, transform_indices = @transform_1, window_bounds = array<i64: 128, 128>}, {pipeline_mode = #tpu.pipeline_mode<synchronous>, transform_indices = @transform_2, window_bounds = array<i64: 128, 128>}, {pipeline_mode = #tpu.pipeline_mode<synchronous>, transform_indices = @transform_3, window_bounds = array<i64: 8, 128>}, {transform_indices = @transform_4, window_bounds = array<i64: 8, 128>}]} {
    %c0 = arith.constant 0 : index
    %c0_0 = arith.constant 0 : index
    %0 = vector.load %arg4[%c0, %c0_0] : memref<8x128xf32, #tpu.memory_space<vmem>>, vector<8x128xf32>
    %1 = vector.extract_strided_slice %0 {offsets = [0, 0], sizes = [1, 128], strides = [1, 1]} : vector<8x128xf32> to vector<1x128xf32>
    %2 = vector.extract_strided_slice %0 {offsets = [1, 0], sizes = [1, 128], strides = [1, 1]} : vector<8x128xf32> to vector<1x128xf32>
    %3 = vector.extract_strided_slice %0 {offsets = [2, 0], sizes = [1, 128], strides = [1, 1]} : vector<8x128xf32> to vector<1x128xf32>
    %4 = vector.extract_strided_slice %0 {offsets = [3, 0], sizes = [1, 128], strides = [1, 1]} : vector<8x128xf32> to vector<1x128xf32>
    %5 = vector.extract_strided_slice %0 {offsets = [4, 0], sizes = [1, 128], strides = [1, 1]} : vector<8x128xf32> to vector<1x128xf32>
    %6 = vector.extract_strided_slice %0 {offsets = [5, 0], sizes = [1, 128], strides = [1, 1]} : vector<8x128xf32> to vector<1x128xf32>
    %c0_1 = arith.constant 0 : index
    %c0_2 = arith.constant 0 : index
    %7 = vector.load %arg2[%c0_1, %c0_2] : memref<128x128xbf16, #tpu.memory_space<vmem>>, vector<128x128xbf16>
    %c0_3 = arith.constant 0 : index
    %c0_4 = arith.constant 0 : index
    %8 = vector.load %arg3[%c0_3, %c0_4] : memref<128x128xbf16, #tpu.memory_space<vmem>>, vector<128x128xbf16>
    %c0_5 = arith.constant 0 : index
    %c0_6 = arith.constant 0 : index
    %9 = vector.load %arg1[%c0_5, %c0_6] : memref<8x128xf32, #tpu.memory_space<vmem>>, vector<8x128xf32>
    %10 = arith.truncf %9 : vector<8x128xf32> to vector<8x128xbf16>
    %cst = arith.constant dense<0.000000e+00> : vector<8x128xf32>
    %11 = tpu.matmul %10, %7, %cst {dimension_numbers = #tpu.dot_dimension_numbers<[1], [0], [0], [1], [0, 0, 1, 1], [], []>} : vector<8x128xbf16>, vector<128x128xbf16>, vector<8x128xf32> -> vector<8x128xf32>
    %12 = vector.broadcast %1 : vector<1x128xf32> to vector<8x128xf32>
    %13 = arith.addf %11, %12 : vector<8x128xf32>
    %cst_7 = arith.constant dense<0.000000e+00> : vector<8xf32>
    %14 = vector.multi_reduction <add>, %13, %cst_7 [1] : vector<8x128xf32> to vector<8xf32>
    %15 = vector.shape_cast %14 : vector<8xf32> to vector<8x1xf32>
    %cst_8 = arith.constant 7.812500e-03 : f32
    %16 = vector.broadcast %cst_8 : f32 to vector<8x1xf32>
    %17 = arith.mulf %15, %16 : vector<8x1xf32>
    %18 = arith.mulf %13, %13 : vector<8x128xf32>
    %cst_9 = arith.constant dense<0.000000e+00> : vector<8xf32>
    %19 = vector.multi_reduction <add>, %18, %cst_9 [1] : vector<8x128xf32> to vector<8xf32>
    %20 = vector.shape_cast %19 : vector<8xf32> to vector<8x1xf32>
    %cst_10 = arith.constant 7.812500e-03 : f32
    %21 = vector.broadcast %cst_10 : f32 to vector<8x1xf32>
    %22 = arith.mulf %20, %21 : vector<8x1xf32>
    %23 = arith.mulf %17, %17 : vector<8x1xf32>
    %24 = arith.subf %22, %23 : vector<8x1xf32>
    %cst_11 = arith.constant 0.000000e+00 : f32
    %25 = vector.broadcast %cst_11 : f32 to vector<8x1xf32>
    %26 = arith.maximumf %24, %25 : vector<8x1xf32>
    %cst_12 = arith.constant 9.99999974E-6 : f32
    %27 = vector.broadcast %cst_12 : f32 to vector<8x1xf32>
    %28 = arith.addf %26, %27 : vector<8x1xf32>
    %29 = math.rsqrt %28 : vector<8x1xf32>
    %30 = vector.broadcast %17 : vector<8x1xf32> to vector<8x128xf32>
    %31 = arith.subf %13, %30 : vector<8x128xf32>
    %32 = vector.broadcast %29 : vector<8x1xf32> to vector<8x128xf32>
    %33 = arith.mulf %31, %32 : vector<8x128xf32>
    %34 = vector.broadcast %2 : vector<1x128xf32> to vector<8x128xf32>
    %35 = arith.mulf %33, %34 : vector<8x128xf32>
    %36 = vector.broadcast %3 : vector<1x128xf32> to vector<8x128xf32>
    %37 = arith.addf %35, %36 : vector<8x128xf32>
    %cst_13 = arith.constant 0.000000e+00 : f32
    %38 = vector.broadcast %cst_13 : f32 to vector<8x128xf32>
    %39 = arith.maximumf %37, %38 : vector<8x128xf32>
    %40 = arith.truncf %39 : vector<8x128xf32> to vector<8x128xbf16>
    %cst_14 = arith.constant dense<0.000000e+00> : vector<8x128xf32>
    %41 = tpu.matmul %40, %8, %cst_14 {dimension_numbers = #tpu.dot_dimension_numbers<[1], [0], [0], [1], [0, 0, 1, 1], [], []>} : vector<8x128xbf16>, vector<128x128xbf16>, vector<8x128xf32> -> vector<8x128xf32>
    %42 = vector.broadcast %4 : vector<1x128xf32> to vector<8x128xf32>
    %43 = arith.addf %41, %42 : vector<8x128xf32>
    %cst_15 = arith.constant dense<0.000000e+00> : vector<8xf32>
    %44 = vector.multi_reduction <add>, %43, %cst_15 [1] : vector<8x128xf32> to vector<8xf32>
    %45 = vector.shape_cast %44 : vector<8xf32> to vector<8x1xf32>
    %cst_16 = arith.constant 7.812500e-03 : f32
    %46 = vector.broadcast %cst_16 : f32 to vector<8x1xf32>
    %47 = arith.mulf %45, %46 : vector<8x1xf32>
    %48 = arith.mulf %43, %43 : vector<8x128xf32>
    %cst_17 = arith.constant dense<0.000000e+00> : vector<8xf32>
    %49 = vector.multi_reduction <add>, %48, %cst_17 [1] : vector<8x128xf32> to vector<8xf32>
    %50 = vector.shape_cast %49 : vector<8xf32> to vector<8x1xf32>
    %cst_18 = arith.constant 7.812500e-03 : f32
    %51 = vector.broadcast %cst_18 : f32 to vector<8x1xf32>
    %52 = arith.mulf %50, %51 : vector<8x1xf32>
    %53 = arith.mulf %47, %47 : vector<8x1xf32>
    %54 = arith.subf %52, %53 : vector<8x1xf32>
    %cst_19 = arith.constant 0.000000e+00 : f32
    %55 = vector.broadcast %cst_19 : f32 to vector<8x1xf32>
    %56 = arith.maximumf %54, %55 : vector<8x1xf32>
    %cst_20 = arith.constant 9.99999974E-6 : f32
    %57 = vector.broadcast %cst_20 : f32 to vector<8x1xf32>
    %58 = arith.addf %56, %57 : vector<8x1xf32>
    %59 = math.rsqrt %58 : vector<8x1xf32>
    %60 = vector.broadcast %47 : vector<8x1xf32> to vector<8x128xf32>
    %61 = arith.subf %43, %60 : vector<8x128xf32>
    %62 = vector.broadcast %59 : vector<8x1xf32> to vector<8x128xf32>
    %63 = arith.mulf %61, %62 : vector<8x128xf32>
    %64 = vector.broadcast %5 : vector<1x128xf32> to vector<8x128xf32>
    %65 = arith.mulf %63, %64 : vector<8x128xf32>
    %66 = vector.broadcast %6 : vector<1x128xf32> to vector<8x128xf32>
    %67 = arith.addf %65, %66 : vector<8x128xf32>
    %68 = arith.addf %9, %67 : vector<8x128xf32>
    %c0_21 = arith.constant 0 : index
    %c0_22 = arith.constant 0 : index
    %69 = vector.load %arg5[%c0_21, %c0_22] : memref<8x128xf32, #tpu.memory_space<vmem>>, vector<8x128xf32>
    tpu.vector_store %arg5[%c0_21, %c0_22], %68 {strides = array<i32>} : memref<8x128xf32, #tpu.memory_space<vmem>>, vector<8x128xf32>,
    return
  }
  func.func @transform_0(%arg0: i32) -> (i32, i32) {
    %c0_i32 = arith.constant 0 : i32
    %c0_i32_0 = arith.constant 0 : i32
    return %arg0, %c0_i32 : i32, i32
  }
  func.func @transform_1(%arg0: i32) -> (i32, i32) {
    %c0_i32 = arith.constant 0 : i32
    %c0_i32_0 = arith.constant 0 : i32
    %c0_i32_1 = arith.constant 0 : i32
    return %c0_i32, %c0_i32_0 : i32, i32
  }
  func.func @transform_2(%arg0: i32) -> (i32, i32) {
    %c0_i32 = arith.constant 0 : i32
    %c0_i32_0 = arith.constant 0 : i32
    %c0_i32_1 = arith.constant 0 : i32
    return %c0_i32, %c0_i32_0 : i32, i32
  }
  func.func @transform_3(%arg0: i32) -> (i32, i32) {
    %c0_i32 = arith.constant 0 : i32
    %c0_i32_0 = arith.constant 0 : i32
    %c0_i32_1 = arith.constant 0 : i32
    return %c0_i32, %c0_i32_0 : i32, i32
  }
  func.func @transform_4(%arg0: i32) -> (i32, i32) {
    %c0_i32 = arith.constant 0 : i32
    %c0_i32_0 = arith.constant 0 : i32
    return %arg0, %c0_i32 : i32, i32
  }
}

</mosaic_0001>

<bundles_post_ra>
// kernel: tpu_custom_call.1
= control target key start
LH: loop header
LB: loop body
LE: loop exit
PB: predicated region body
PF: predicated region fallthrough
CT: control target
= control target key end

     0   :  { %9 = vsyncpa [#allocation3], 0  ;;  %s1270_s0 = inlined_call_operand.hbm [shape: f32[16,128], index: 0, kind: input, shape index: {}]   ;;  %s1271_s1 = inlined_call_operand.hbm [shape: bf16[128,128], index: 1, kind: input, shape index: {}]   ;;  %s1272_s2 = inlined_call_operand.hbm [shape: bf16[128,128], index: 2, kind: input, shape index: {}]   ;;  %s1273_s3 = inlined_call_operand.hbm [shape: f32[8,128], index: 3, kind: input, shape index: {}]   ;;  %s1274_s4 = inlined_call_operand.hbm [shape: f32[16,128], index: 4, kind: output, shape index: {}]  }
   0x1   :  { %11 = vsyncpa [#allocation3 + $0x1], 0 }
   0x2   :  { %12 = vsyncpa [#allocation6], 0 }
   0x3   :  { %13 = vsyncpa [#allocation9], 0 }
   0x4   :  { %14 = vsyncpa [#allocation4], 0 }
   0x5   :  { %16 = vsyncpa [#allocation4 + $0x1], 0  ;;  %s1047_s15 = smov 0   ;;  %s1049_s16 = smov 0  }
   0x6   :  { %s1051_s17 = smov 0   ;;  %s1053_s18 = smov 0  }
   0x7 LB: > { %s1068_s19 = sadd.s32 4294967295, %s1011_s18   ;;  %s640_s20 = sadd.s32 4294967294, %s1011_s18   ;;  %s1011_s18 = sphi %s1053_s18, %s1298_s18   ;;  %s1007_s17 = sphi %s1051_s17, %s1297_s17   ;;  %s1003_s16 = sphi %s1049_s16, %s1296_s16   ;;  %s999_s15 = sphi %s1047_s15, %s1295_s15  }
   0x8   : > { %p42_p0 = scmp.ne.s32.totalorder %s1003_s16, %s999_s15  ;;  %p1275_p1 = scmp.eq.s32.totalorder %s1068_s19, 0 }
   0x9   : > { %p135_p3 = scmp.eq.s32.totalorder %s640_s20, 1  ;;  %p641_p5 = scmp.ge.s32.totalorder %s1011_s18, 1 }
   0xa   : > { %p1077_p4 = por %p1275_p1, %p42_p0  ;;  %p142_p7 = scmp.lt.s32.totalorder %s1011_s18, 3 }
   0xb   : > { %p1082_p6 = por %p135_p3, %p42_p0  ;;  %s1013_s24 = smov [#allocation5]  }
   0xc   : > { %s1279_s21 = scalar_select %p1077_p4, 1, 0 }
   0xd   : > { %s1280_s22 = scalar_select %p1082_p6, 1, 0 }
   0xe   : > { %p1087_p8 = pnand %p641_p5, %p142_p7  ;;  %s154_s25 = sshll.u32 %s1013_s24, 4  ;;  %s155_s25 = int_to_ptr.vmem [resolvable:$true] %s154_s25 }
   0xf   : > { %s1014_s27 = smov [#allocation7]   ;;  %s1015_s29 = smov [#allocation8]  }
  0x10   : > { %s1281_s23 = scalar_select %p1087_p8, 1, 0 }
  0x11   : > { %p748_p9 = pneg %p1087_p8  ;;  %s167_s28 = sshll.u32 %s1014_s27, 4  ;;  %s168_s28 = int_to_ptr.vmem [resolvable:$true] %s167_s28 }
  0x12   : > { %s181_s30 = sshll.u32 %s1015_s29, 4  ;;  %s844_s5 = scalar_lea.vmem %s155_s25, 1024  ;;  %s182_s30 = int_to_ptr.vmem [resolvable:$true] %s181_s30 }
  0x13   : > { %p1096_p11 = pnand %p748_p9, %p1275_p1  ;;  %p845_p13 = scmp.ne.s32.totalorder %s155_s25, %s844_s5 }
  0x14   : > { %p852_p5 = scmp.lt.s32.totalorder %s155_s25, %s155_s25  ;;  %p853_p7 = scmp.lt.s32.totalorder %s844_s5, %s844_s5 }
  0x15   : > { %p835_p12 = pneg %p1096_p11 }
  0x16   : > { %p854_p9 = por %p853_p7, %p852_p5 }
  0x17   : > { %p847_p0 = pnand %p845_p13, %p835_p12 }
  0x19   : > { %p848_p3 = pneg %p847_p0 }
  0x1b   : > { %p855_p10 = pnand %p854_p9, %p848_p3 }
  0x1d   : > { %858 = shalt.err (!%p855_p10)
}
  0x1e   : > { %s1016_s6 = smov 64   ;;  %s1017_s7 = smov 4  }
  0x1f   : > { %751 = dma.hbm_to_vmem [thread:$0]  (!%p1096_p11), %s1271_s1, 1024, %s155_s25, [#allocation6], %s1016_s6, %s1016_s6, %s1017_s7  }
  0x20   : > { %s870_s10 = scalar_lea.vmem %s168_s28, 1024  ;;  %p878_p2 = scmp.lt.s32.totalorder %s168_s28, %s168_s28 }
  0x21   : > { %p871_p1 = scmp.ne.s32.totalorder %s168_s28, %s870_s10  ;;  %p879_p6 = scmp.lt.s32.totalorder %s870_s10, %s870_s10 }
  0x23   : > { %p873_p13 = pnand %p871_p1, %p835_p12  ;;  %p880_p5 = por %p879_p6, %p878_p2 }
  0x25   : > { %p874_p0 = pneg %p873_p13 }
  0x27   : > { %p881_p3 = pnand %p880_p5, %p874_p0 }
  0x29   : > { %884 = shalt.err (!%p881_p3)
}
  0x2a   : > { %754 = dma.hbm_to_vmem [thread:$0]  (!%p1096_p11), %s1272_s2, 1024, %s168_s28, [#allocation6], %s1016_s6, %s1016_s6, %s1017_s7  }
  0x2b   : > { %s896_s13 = scalar_lea.vmem %s182_s30, 128  ;;  %p904_p9 = scmp.lt.s32.totalorder %s182_s30, %s182_s30 }
  0x2c   : > { %p897_p10 = scmp.ne.s32.totalorder %s182_s30, %s896_s13  ;;  %p905_p13 = scmp.lt.s32.totalorder %s896_s13, %s896_s13 }
  0x2e   : > { %p899_p7 = pnand %p897_p10, %p835_p12  ;;  %p906_p4 = por %p905_p13, %p904_p9 }
  0x30   : > { %p900_p1 = pneg %p899_p7 }
  0x32   : > { %p907_p2 = pnand %p906_p4, %p900_p1 }
  0x34   : > { %910 = shalt.err (!%p907_p2)
}
  0x35   : > { %757 = dma.hbm_to_vmem [thread:$0]  (!%p1096_p11), %s1273_s3, 128, %s182_s30, [#allocation9]  }
  0x36   : > { %s1127_s24 = sadd.s32 1, %s1011_s18   ;;  %s29_s26 = sadd.s32 1, %s1007_s17 }
  0x37   : > { %s26_s25 = ssub.s32 %s1011_s18, %s1127_s24  ;;  %p36_p6 = scmp.ne.s32.totalorder %s1007_s17, %s1003_s16 }
  0x38   : > { %p27_p4 = scmp.eq.s32.totalorder %s26_s25, 0  ;;  %p37_p12 = scmp.eq.s32.totalorder %s1011_s18, 0 }
  0x39   : > { %p769_p0 = scmp.lt.s32.totalorder %s1011_s18, 2  ;;  %p1283_p3 = scmp.eq.s32.totalorder %s1068_s19, 1 }
  0x3a   : > { %s1137_s27 = scalar_select %p27_p4, %s1007_s17, %s29_s26  }
  0x3b   : > { %p38_p5 = por %p37_p12, %p36_p6  ;;  %p1141_p10 = por %p1283_p3, %p36_p6 }
  0x3c   : > { %s192_s29 = sand.u32 1, %s1007_s17   ;;  %s647_s5 = sshll.u32 %s1011_s18, 7 }
  0x3d   : > { %s1284_s28 = scalar_select %p1141_p10, 1, 0 }
  0x3e   : > { %s646_s30 = sshll.u32 %s192_s29, 3  ;;  %s1150_s8 = scalar_lea.hbm %s1270_s0, %s647_s5 }
  0x3f   : > { %s196_s9 = scalar_lea.vmem [#allocation2], %s646_s30  ;;  %p1152_p11 = pnand %p769_p0, %p38_p5 }
  0x40   : > { %s203_s10 = sshll.u32 %s196_s9, 4  ;;  %s193_s12 = scalar_lea.sflag [#allocation3], %s192_s29  ;;  %s204_s10 = int_to_ptr.vmem [resolvable:$true] %s203_s10 }
  0x41   : > { %s911_s13 = scalar_lea.hbm %s1150_s8, 128  ;;  %p913_p1 = pneg %p1152_p11 }
  0x42   : > { %p912_p7 = scmp.ne.s32.totalorder %s1150_s8, %s911_s13  ;;  %s916_s25 = scalar_lea.hbm %s1270_s0, 256 }
  0x43   : > { %p917_p2 = scmp.lt.s32.totalorder %s1150_s8, %s1270_s0  ;;  %p918_p4 = scmp.lt.s32.totalorder %s916_s25, %s911_s13 }
  0x44   : > { %p914_p9 = pnand %p913_p1, %p912_p7 }
  0x45   : > { %p919_p6 = por %p918_p4, %p917_p2 }
  0x46   : > { %p915_p13 = pneg %p914_p9 }
  0x48   : > { %p920_p12 = pnand %p919_p6, %p915_p13 }
  0x4a   : > { %923 = shalt.err (!%p920_p12)
}
  0x4b   : > { %s924_s30 = scalar_lea.vmem %s204_s10, 128  ;;  %s1018_s29 = smov [#allocation2]  }
  0x4c   : > { %p925_p0 = scmp.ne.s32.totalorder %s204_s10, %s924_s30  ;;  %s929_s6 = sshll.u32 %s1018_s29, 4  ;;  %s930_s6 = int_to_ptr.vmem [resolvable:$false] %s929_s6 }
  0x4d   : > { %s931_s7 = scalar_lea.vmem %s930_s6, 256  ;;  %p932_p7 = scmp.lt.s32.totalorder %s204_s10, %s930_s6 }
  0x4e   : > { %p927_p5 = pnand %p925_p0, %p913_p1  ;;  %p933_p9 = scmp.lt.s32.totalorder %s931_s7, %s924_s30 }
  0x50   : > { %p928_p3 = pneg %p927_p5  ;;  %p934_p10 = por %p933_p9, %p932_p7 }
  0x52   : > { %p935_p8 = pnand %p934_p10, %p928_p3 }
  0x54   : > { %938 = shalt.err (!%p935_p8)
}
  0x55   : > { %761 = dma.hbm_to_vmem [thread:$0]  (!%p1152_p11), %s1150_s8, 128, %s204_s10, %s193_s12  }
  0x56   : > { %p1286_p13 = scmp.ne.s32.totalorder %s1281_s23, 0 }
  0x57   : > { %s1173_s9 = sand.u32 (!%p1286_p13), 1, %s1003_s16   ;;  %p1287_p8 = scmp.ne.s32.totalorder (!%p1286_p13), %s1279_s21, 0 }
  0x58   : > { %212 = sbr.rel (%p1286_p13) target bundleno = 883 (0x373), region = 36  ;;  %s649_s13 = sshll.u32 (!%p1286_p13), %s1173_s9, 3 }
  0x59   : > { %s215_s14 = scalar_lea.sflag (!%p1286_p13), [#allocation3], %s1173_s9  ;;  %s1179_s20 = scalar_lea.vmem (!%p1286_p13), [#allocation2], %s649_s13 }
  0x5d   : > { %982 = dma.done.wait (%p1287_p8), %s215_s14, 128  }
  0x5e   : > { %984 = vsyncadd (%p1287_p8), %s215_s14, 4294967168  ;;  %p1288_p10 = scmp.eq.s32.totalorder %s1068_s19, 0 }
  0x60   : > { %986 = dma.done.wait (%p1288_p10), [#allocation6], 2048   ;;  %p1289_p11 = pmov %p1288_p10 }
  0x61   : > { %p1290_p1 = pmov %p1288_p10 }
  0x62   : > { %988 = vsyncadd (%p1289_p11), [#allocation6], 4294965248 }
  0x63   : > { %990 = dma.done.wait (%p1290_p1), [#allocation9], 128   ;;  %p1291_p2 = pmov %p1290_p1 }
  0x64   : > { %v1019_v0 = vmov 0.0   ;;  %vm1020_vm0 = vmmov 0   ;;  %v813_v1 = vld [vmem:[#allocation5 + $0x38] sm:$0xff]   ;;  %v814_v2 = vld [vmem:[#allocation5 + $0x30] sm:$0xff]   ;;  %v815_v3 = vld [vmem:[#allocation5 + $0x28] sm:$0xff]   ;;  %v291_v11 = vlaneseq  ;;  %s671_s21 = sshll.u32 %s1068_s19, 7 }
  0x65   : > { %992 = vsyncadd (%p1291_p2), [#allocation9], 4294967168  ;;  %692 = vmatprep.subr.bf16.mxu0 %v1019_v0  ;;  %708 = vmatprep.mubr.msk.bf16.mxu0 %vm1020_vm0, %v1019_v0  ;;  %v816_v4 = vld [vmem:[#allocation5 + $0x20] sm:$0xff]   ;;  %v817_v5 = vld [vmem:[#allocation5 + $0x18] sm:$0xff]   ;;  %s254_s23 = scalar_lea.vmem [#allocation10], %s649_s13  ;;  %s539_s12 = scalar_lea.hbm %s1274_s4, %s671_s21 }
  0x66   : > { %712 = vmatprep.subr.bf16.mxu1 %v1019_v0  ;;  %728 = vmatprep.mubr.msk.bf16.mxu1 %vm1020_vm0, %v1019_v0  ;;  %v818_v6 = vld [vmem:[#allocation5 + $0x10] sm:$0xff]   ;;  %v819_v7 = vld [vmem:[#allocation5 + $0x8] sm:$0xff]   ;;  %v820_v8 = vld [vmem:[#allocation5] sm:$0xff]   ;;  %v1209_v12 = vshrl.u32 %v291_v11, 7  ;;  %s541_s8 = sshll.u32 %s254_s23, 4  ;;  %s528_s25 = scalar_lea.sflag [#allocation4], %s1173_s9  ;;  %s542_s8 = int_to_ptr.vmem [resolvable:$true] %s541_s8 }
  0x67   : > { %693 = vmatpush3.bf16.msra.mxu0 %v813_v1  ;;  %v1204_v9 = vld [vmem:[%s1179_s20] sm:$0xff]  ;;  %v1212_v14 = vld [vmem:[#allocation8] sm:$0xff]  ;;  %v823_v24 = vld [vmem:[#allocation7 + $0x28] sm:$0xff]   ;;  %s939_s26 = scalar_lea.vmem %s542_s8, 128  ;;  %p1292_p6 = scmp.ne.s32.totalorder %s1284_s28, 0 }
  0x68   : > { %694 = vmatprep.subr.bf16.mxu0 %v1019_v0  ;;  %v290_v10 = vpack.c.bf16 %v1204_v9, %v1204_v9  ;;  %v293_v13 = vsub.s32 0, %v1209_v12  ;;  %v821_v22 = vld [vmem:[#allocation7 + $0x38] sm:$0xff]   ;;  %v822_v23 = vld [vmem:[#allocation7 + $0x30] sm:$0xff]   ;;  %v824_v25 = vld [vmem:[#allocation7 + $0x20] sm:$0xff]   ;;  %v399_v38 = vsub.s32 1, %v1209_v12  ;;  %v404_v39 = vsub.s32 2, %v1209_v12  ;;  %p940_p4 = scmp.ne.s32.totalorder %s542_s8, %s939_s26 }
  0x69   : > { %713 = vmatpush3.bf16.msra.mxu1 %v821_v22  ;;  %v825_v26 = vld [vmem:[#allocation7 + $0x18] sm:$0xff]   ;;  %v826_v27 = vld [vmem:[#allocation7 + $0x10] sm:$0xff]   ;;  %v827_v28 = vld [vmem:[#allocation7 + $0x8] sm:$0xff]   ;;  %v411_v49 = vsub.s32 3, %v1209_v12  ;;  %v517_v1 = vsub.s32 4, %v1209_v12  ;;  %s1021_s5 = smov [#allocation10]  }
  0x6a   : > { %v294_v15 = vrot.slane %v1212_v14, %v293_v13  ;;  %714 = vmatprep.subr.bf16.mxu1 %v1019_v0  ;;  %v828_v29 = vld [vmem:[#allocation7] sm:$0xff]   ;;  %v400_v41 = vrot.slane %v1212_v14, %v399_v38  ;;  %v405_v44 = vrot.slane %v1212_v14, %v404_v39  ;;  %p941_p12 = pnand %p940_p4, %p1292_p6  ;;  %s943_s19 = sshll.u32 %s1021_s5, 4  ;;  %s944_s19 = int_to_ptr.vmem [resolvable:$false] %s943_s19 }
  0x6b   : > { %695 = vmatpush3.bf16.msra.mxu0 %v814_v2  ;;  %v412_v50 = vrot.slane %v1212_v14, %v411_v49  ;;  %v522_v2 = vsub.s32 5, %v1209_v12  ;;  %s945_s30 = scalar_lea.vmem %s944_s19, 256  ;;  %p946_p5 = scmp.lt.s32.totalorder %s542_s8, %s944_s19 }
  0x6c   : > { %696 = vmatprep.subr.bf16.mxu0 %v1019_v0  ;;  %p942_p0 = pneg %p941_p12  ;;  %p947_p3 = scmp.lt.s32.totalorder %s945_s30, %s939_s26 }
  0x6d   : > { %715 = vmatpush3.bf16.msra.mxu1 %v822_v23 }
  0x6e   : > { %716 = vmatprep.subr.bf16.mxu1 %v1019_v0  ;;  %p948_p7 = por %p947_p3, %p946_p5 }
  0x6f   : > { %697 = vmatpush3.bf16.msra.mxu0 %v815_v3 }
  0x70   : > { %698 = vmatprep.subr.bf16.mxu0 %v1019_v0  ;;  %p949_p9 = pnand %p948_p7, %p942_p0 }
  0x71   : > { %717 = vmatpush3.bf16.msra.mxu1 %v823_v24 }
  0x72   : > { %718 = vmatprep.subr.bf16.mxu1 %v1019_v0 }
  0x73   : > { %699 = vmatpush3.bf16.msra.mxu0 %v816_v4  ;;  %v518_v4 = vrot.slane %v1212_v14, %v517_v1 }
  0x74   : > { %700 = vmatprep.subr.bf16.mxu0 %v1019_v0 }
  0x75   : > { %719 = vmatpush3.bf16.msra.mxu1 %v824_v25 }
  0x76   : > { %720 = vmatprep.subr.bf16.mxu1 %v1019_v0 }
  0x77   : > { %701 = vmatpush3.bf16.msra.mxu0 %v817_v5 }
  0x78   : > { %702 = vmatprep.subr.bf16.mxu0 %v1019_v0 }
  0x79   : > { %721 = vmatpush3.bf16.msra.mxu1 %v825_v26 }
  0x7a   : > { %722 = vmatprep.subr.bf16.mxu1 %v1019_v0 }
  0x7b   : > { %703 = vmatpush3.bf16.msra.mxu0 %v818_v6 }
  0x7c   : > { %704 = vmatprep.subr.bf16.mxu0 %v1019_v0 }
  0x7d   : > { %723 = vmatpush3.bf16.msra.mxu1 %v826_v27 }
  0x7e   : > { %724 = vmatprep.subr.bf16.mxu1 %v1019_v0 }
  0x7f   : > { %705 = vmatpush3.bf16.msra.mxu0 %v819_v7  ;;  %v523_v7 = vrot.slane %v1212_v14, %v522_v2 }
  0x80   : > { %706 = vmatprep.subr.bf16.mxu0 %v1019_v0 }
  0x81   : > { %725 = vmatpush3.bf16.msra.mxu1 %v827_v28 }
  0x82   : > { %726 = vmatprep.subr.bf16.mxu1 %v1019_v0 }
  0x83   : > { %707 = vmatpush3.bf16.msra.mxu0 %v820_v8 }
  0x85   : > { %727 = vmatpush3.bf16.msra.mxu1 %v828_v29 }
  0x86   : > { %709 = vmatmul.mubr.bf16.vlgmr.msra.gmra.mxu0 %v290_v10 }
 0x146   : > { %v377_v16 = vpop.f32.mrf.mxu0 }
 0x147   : > { %v378_v17 = vadd.f32 %v377_v16, %v294_v15 }
 0x148   : > { %v710_v18 = vpop.f32.mrf.mxu0 }
 0x149   : > { %383 = vadd.xlane.f32.xlu0 %v378_v17  ;;  %v386_v20 = vmul.f32 %v378_v17, %v378_v17 }
 0x14a   : > { %v380_v19 = vpop.f32.mrf.mxu0 }
 0x14c   : > { %v711_v21 = vpop.f32.mrf.mxu0 }
 0x14d   : > { %387 = vadd.xlane.f32.xlu0 %v386_v20 }
 0x1d2   : > { %v384_v30 = vpop.xlane.xlu0 %383 }
 0x1d3   : > { %v385_v31 = vmul.f32 0.0078125, %v384_v30 }
 0x1d5   : > { %v390_v33 = vmul.f32 %v385_v31, %v385_v31  ;;  %v395_v40 = vsub.f32 %v378_v17, %v385_v31 }
 0x1d6   : > { %v388_v32 = vpop.xlane.xlu0 %387 }
 0x1d7   : > { %v389_v34 = vmul.f32 0.0078125, %v388_v32 }
 0x1d9   : > { %v391_v35 = vsub.f32 %v389_v34, %v390_v33 }
 0x1db   : > { %v392_v36 = vmax.f32 %v391_v35, 0.0 }
 0x1dd   : > { %v393_v37 = vadd.f32 1e-05, %v392_v36 }
 0x1df   : > { %829 = vrsqrt.f32 %v393_v37 }
 0x1ec   : > { %v830_v42 = vpop.eup %829 }
 0x1ed   : > { %v396_v43 = vmul.f32 %v830_v42, %v395_v40 }
 0x1ef   : > { %v401_v45 = vmul.f32 %v400_v41, %v396_v43 }
 0x1f1   : > { %v406_v46 = vadd.f32 %v405_v44, %v401_v45 }
 0x1f3   : > { %v407_v47 = vmax.f32 %v406_v46, 0.0 }
 0x1f5   : > { %v408_v48 = vpack.c.bf16 %v407_v47, %v407_v47 }
 0x1f7   : > { %729 = vmatmul.mubr.bf16.vlgmr.msra.gmra.mxu1 %v408_v48 }
 0x2b7   : > { %v495_v51 = vpop.f32.mrf.mxu1 }
 0x2b8   : > { %v496_v52 = vadd.f32 %v495_v51, %v412_v50 }
 0x2b9   : > { %v730_v53 = vpop.f32.mrf.mxu1 }
 0x2ba   : > { %501 = vadd.xlane.f32.xlu1 %v496_v52  ;;  %v504_v55 = vmul.f32 %v496_v52, %v496_v52 }
 0x2bb   : > { %v498_v54 = vpop.f32.mrf.mxu1 }
 0x2bd   : > { %v731_v56 = vpop.f32.mrf.mxu1 }
 0x2be   : > { %505 = vadd.xlane.f32.xlu1 %v504_v55 }
 0x343   : > { %v502_v57 = vpop.xlane.xlu1 %501 }
 0x344   : > { %v503_v58 = vmul.f32 0.0078125, %v502_v57 }
 0x346   : > { %v508_v60 = vmul.f32 %v503_v58, %v503_v58  ;;  %v513_v3 = vsub.f32 %v496_v52, %v503_v58 }
 0x347   : > { %v506_v59 = vpop.xlane.xlu1 %505 }
 0x348   : > { %v507_v61 = vmul.f32 0.0078125, %v506_v59 }
 0x34a   : > { %v509_v62 = vsub.f32 %v507_v61, %v508_v60 }
 0x34c   : > { %v510_v63 = vmax.f32 %v509_v62, 0.0 }
 0x34e   : > { %v511_v0 = vadd.f32 1e-05, %v510_v63 }
 0x350   : > { %831 = vrsqrt.f32 %v511_v0 }
 0x35d   : > { %v832_v5 = vpop.eup %831 }
 0x35e   : > { %v514_v6 = vmul.f32 %v832_v5, %v513_v3 }
 0x360   : > { %v519_v8 = vmul.f32 %v518_v4, %v514_v6 }
 0x362   : > { %v524_v10 = vadd.f32 %v523_v7, %v519_v8 }
 0x364   : > { %v525_v11 = vadd.f32 %v524_v10, %v1204_v9 }
 0x366   : > { %526 = vst [vmem:[%s254_s23] sm:$0xff] %v525_v11 }
 0x367   : > { %952 = shalt.err (!%p949_p9)
}
 0x368   : > { %s953_s29 = scalar_lea.hbm %s539_s12, 128  ;;  %s957_s9 = scalar_lea.hbm %s1274_s4, 256 }
 0x369   : > { %p954_p13 = scmp.ne.s32.totalorder %s539_s12, %s953_s29  ;;  %p958_p11 = scmp.lt.s32.totalorder %s539_s12, %s1274_s4 }
 0x36a   : > { %p959_p1 = scmp.lt.s32.totalorder %s957_s9, %s953_s29 }
 0x36b   : > { %p955_p8 = pnand %p954_p13, %p1292_p6 }
 0x36c   : > { %p960_p2 = por %p959_p1, %p958_p11 }
 0x36d   : > { %p956_p10 = pneg %p955_p8 }
 0x36f   : > { %p961_p4 = pnand %p960_p2, %p956_p10 }
 0x371   : > { %964 = shalt.err (!%p961_p4)
}
 0x372   : > { %746 = dma.vmem_to_hbm [thread:$0]  (%p1292_p6), %s542_s8, 128, %s539_s12, %s528_s25  }
 0x373 PF: > { %s553_s20 = sand.u32 1, %s999_s15   ;;  %p1293_p12 = scmp.ne.s32.totalorder %s1280_s22, 0 }
 0x374   : > { %p1294_p0 = scmp.ge.s32.totalorder %s1011_s18, 2  ;;  %s554_s21 = scalar_lea.sflag [#allocation4], %s553_s20 }
 0x376   : > { %p763_p5 = pnand %p1294_p0, %p1293_p12 }
 0x378   : > { %p764_p3 = pneg %p763_p5 }
 0x37a   : > { %994 = dma.done.wait (%p764_p3), %s554_s21, 128  }
 0x37b   : > { %996 = vsyncadd (%p764_p3), %s554_s21, 4294967168  ;;  %p19_p7 = scmp.ge.s32.totalorder %s1127_s24, 4   ;;  %s1295_s15 = smov %s1003_s16 }
 0x37c   : > { %s1296_s16 = smov %s1007_s17  ;;  %s1297_s17 = smov %s1137_s27 }
 0x37d   : > { %s1298_s18 = smov %s1127_s24  ;;  %21 = sbr.rel (!%p19_p7) target bundleno = 7 (0x7), region = 93 }
 0x382   :  { %559 = vsyncpa [#allocation3], 1 }
 0x383   :  { %561 = vsyncpa [#allocation3 + $0x1], 1 }
 0x384   :  { %562 = vsyncpa [#allocation6], 1 }
 0x385   :  { %563 = vsyncpa [#allocation9], 1 }
 0x386   :  { %564 = vsyncpa [#allocation4], 1 }
 0x387   :  { %566 = vsyncpa [#allocation4 + $0x1], 1 }

</bundles_post_ra>
